<compile_context>
chip_gen: v6e
topology: v6e:2x2x1
jax: 0.10.0
libtpu: 0.0.40
codegen_flags: <defaults>
</compile_context>

<pallas_src>
import functools

import jax
import jax.numpy as jnp
from jax.experimental import pallas as pl
from jax.experimental.pallas import tpu as pltpu


# ---------------------------------------------------------------------------
# Fused kernel: gather pre-projected embeddings -> encoder -> classifier ->
#               decoder -> generator, one grid step per batch row.
# ---------------------------------------------------------------------------

def fused_kernel(src_idx_ref, trg_idx_ref, cn_idx_ref,          # SMEM (prefetch)
                 src_mask_ref, trg_mask_ref, pool_ref,          # (1,S,1)/(1,T,1)
                 enc_tab_ref, cn_enc_ref, b_enc_ref,            # (Vs,Hp)(Vc,Hp)(1,Hp)
                 w_clf_ref, b_clf_ref,                          # (Hp,Cp)(1,Cp)
                 dec_tab_ref, cn_dec_ref, b_dec_ref,            # (Vt,Hp)(Vc,Hp)(1,Hp)
                 w_gen_ref, b_gen_ref,                          # (Hp,Vtp)(1,Vtp)
                 clf_ref, dec_ref):                             # (1,S,Cp)(1,T,Vtp)
    f32, bf16 = jnp.float32, jnp.bfloat16
    b = pl.program_id(0)
    S = src_mask_ref.shape[1]
    T = trg_mask_ref.shape[1]

    def gather_rows(tab_ref, idx_ref, base, n, off):
        # Row gather driven by SMEM indices: one dynamic (1, Hp) slice per
        # token, concatenated along sublanes, plus the per-batch base row.
        # TODO(synk): for vocabularies too large for VMEM, replace with a
        # manual make_async_copy gather from an HBM-resident table.
        rows = [tab_ref[pl.ds(idx_ref[off + i], 1), :] for i in range(n)]
        return jnp.concatenate(rows, axis=0) + base              # (n, Hp)

    cn = cn_idx_ref[b]

    # --- encoder: gathered pre-projected token rows + condition + bias -----
    enc_base = cn_enc_ref[pl.ds(cn, 1), :] + b_enc_ref[...]      # (1, Hp)
    hid_raw = gather_rows(enc_tab_ref, src_idx_ref, enc_base, S, b * S)
    sm = src_mask_ref[0]                                         # (S, 1)
    hid = hid_raw * sm                      # zero padded steps (pad_packed-like)

    # encoder_final: masked mean; pool_ref already holds mask / max(len, 1),
    # so this is a weighted sum (no divide in-kernel).
    final = jnp.sum(hid_raw * pool_ref[0], axis=0, keepdims=True)   # (1, Hp)

    # --- classifier over encoder hidden states ------------------------------
    clf_ref[0] = (jnp.dot(hid.astype(bf16), w_clf_ref[...],
                          preferred_element_type=f32)
                  + b_clf_ref[...])                              # (S, Cp)

    # --- decoder: gathered rows + condition + bias + encoder_final ---------
    dec_base = cn_dec_ref[pl.ds(cn, 1), :] + b_dec_ref[...] + final   # (1, Hp)
    pre = gather_rows(dec_tab_ref, trg_idx_ref, dec_base, T, b * T)
    h = jnp.tanh(pre)                                            # f32 elementwise
    tm = trg_mask_ref[0]                                         # (T, 1)
    dec_ref[0] = ((jnp.dot(h.astype(bf16), w_gen_ref[...],
                           preferred_element_type=f32)
                   + b_gen_ref[...]) * tm)                       # (T, Vtp)
    # TODO(synk): at real target-vocab sizes add a second grid axis tiling
    # Vtp so the generator weights / logits are column-tiled instead of
    # fully VMEM-resident.


# ---------------------------------------------------------------------------
# BlockSpec helpers
# ---------------------------------------------------------------------------

def _resident_spec(arr):
    """Full-array block with a constant index map -> DMA'd once, stays in VMEM."""
    nd, shape = arr.ndim, arr.shape

    def imap(b, *_):
        return (0,) * nd

    return pl.BlockSpec(shape, imap)


def _per_batch_spec(tail):
    """(1, *tail) block indexed by the batch grid coordinate."""
    tail = tuple(tail)

    def imap(b, *_):
        return (b,) + (0,) * len(tail)

    return pl.BlockSpec((1,) + tail, imap)


# ---------------------------------------------------------------------------
# Wrapper
# ---------------------------------------------------------------------------

def conditional_encoder_decoder_forward(src, trg, src_mask, trg_mask,
                                        src_lengths, trg_lengths, cn, prepped):
    """Mirrors ConditionalEncoderDecoder.forward -> (decoder_output, clf_logits)."""
    # TODO(synk): trg_lengths has no effect on this dense stand-in decoder
    # (trg_mask is used instead); the injected RNN/attention sub-modules are
    # replaced by dense per-position blocks.
    B, S = src.shape
    _, T = trg.shape
    C = prepped["num_classes"]
    Vt = prepped["tgt_vocab"]
    Cp = prepped["w_clf"].shape[1]
    Vtp = prepped["w_gen"].shape[1]

    # Indices -> SMEM via scalar prefetch (1-D to keep SMEM padding minimal).
    src_idx = src.reshape(B * S).astype(jnp.int32)
    trg_idx = trg.reshape(B * T).astype(jnp.int32)
    cn_idx = cn.reshape(B).astype(jnp.int32)

    src_mask_f = src_mask.reshape(B, S, 1).astype(jnp.float32)
    trg_mask_f = trg_mask.reshape(B, T, 1).astype(jnp.float32)
    inv_len = 1.0 / jnp.maximum(src_lengths.astype(jnp.float32), 1.0)
    pool_w = src_mask_f * inv_len.reshape(B, 1, 1)               # mask / len

    grid_spec = pltpu.PrefetchScalarGridSpec(
        num_scalar_prefetch=3,
        grid=(B,),
        in_specs=[
            _per_batch_spec((S, 1)),                 # src_mask
            _per_batch_spec((T, 1)),                 # trg_mask
            _per_batch_spec((S, 1)),                 # pool_w
            _resident_spec(prepped["enc_tab"]),
            _resident_spec(prepped["cn_enc"]),
            _resident_spec(prepped["b_enc"]),
            _resident_spec(prepped["w_clf"]),
            _resident_spec(prepped["b_clf"]),
            _resident_spec(prepped["dec_tab"]),
            _resident_spec(prepped["cn_dec"]),
            _resident_spec(prepped["b_dec"]),
            _resident_spec(prepped["w_gen"]),
            _resident_spec(prepped["b_gen"]),
        ],
        out_specs=(_per_batch_spec((S, Cp)), _per_batch_spec((T, Vtp))),
    )

    clf_pad, dec_pad = pl.pallas_call(
        fused_kernel,
        grid_spec=grid_spec,
        out_shape=(jax.ShapeDtypeStruct((B, S, Cp), jnp.float32),
                   jax.ShapeDtypeStruct((B, T, Vtp), jnp.float32)),
        compiler_params=pltpu.CompilerParams(
            dimension_semantics=("parallel",),       # batch rows -> v7x 2x TC
            vmem_limit_bytes=32 * 1024 * 1024),
    )(src_idx, trg_idx, cn_idx,
      src_mask_f, trg_mask_f, pool_w,
      prepped["enc_tab"], prepped["cn_enc"], prepped["b_enc"],
      prepped["w_clf"], prepped["b_clf"],
      prepped["dec_tab"], prepped["cn_dec"], prepped["b_dec"],
      prepped["w_gen"], prepped["b_gen"])

    clf_logits = clf_pad[:, :, :C]
    dec_out = dec_pad[:, :, :Vt]
    return dec_out, clf_logits


# ---------------------------------------------------------------------------
# Parameter init (logical shapes) + one-time prep
#   - embedding tables folded into the encoder/decoder input projections
#   - condition embedding pre-projected per condition id
#   - output-facing dims zero-padded to 128 lanes; MXU weights cast to bf16
# ---------------------------------------------------------------------------

def init_params(key, src_vocab, tgt_vocab, cn_vocab, emb, cn_emb,
                hidden, num_classes):
    ks = jax.random.split(key, 11)
    s = 0.1
    n = jax.random.normal
    return {
        "emb_src": s * n(ks[0], (src_vocab, emb), jnp.float32),
        "emb_trg": s * n(ks[1], (tgt_vocab, emb), jnp.float32),
        "emb_cn":  s * n(ks[2], (cn_vocab, cn_emb), jnp.float32),
        "w_enc":   s * n(ks[3], (emb + cn_emb, hidden), jnp.float32),
        "b_enc":   s * n(ks[4], (1, hidden), jnp.float32),
        "w_clf":   s * n(ks[5], (hidden, num_classes), jnp.float32),
        "b_clf":   s * n(ks[6], (1, num_classes), jnp.float32),
        "w_dec":   s * n(ks[7], (emb + cn_emb, hidden), jnp.float32),
        "b_dec":   s * n(ks[8], (1, hidden), jnp.float32),
        "w_gen":   s * n(ks[9], (hidden, tgt_vocab), jnp.float32),
        "b_gen":   s * n(ks[10], (1, tgt_vocab), jnp.float32),
    }


def _round_up(n, m=128):
    return ((n + m - 1) // m) * m


def prepare_params(p):
    emb = p["emb_src"].shape[1]
    hidden = p["w_enc"].shape[1]
    ncls = p["w_clf"].shape[1]
    vt = p["w_gen"].shape[1]
    Hp, Cp, Vtp = _round_up(hidden), _round_up(ncls), _round_up(vt)

    def pad_cols(x, cols):
        return jnp.pad(x, ((0, 0), (0, cols - x.shape[1])))

    def pad_both(x, rows, cols):
        return jnp.pad(x, ((0, rows - x.shape[0]), (0, cols - x.shape[1])))

    w_enc_e, w_enc_c = p["w_enc"][:emb], p["w_enc"][emb:]
    w_dec_e, w_dec_c = p["w_dec"][:emb], p["w_dec"][emb:]

    return {
        "hidden": hidden, "num_classes": ncls, "tgt_vocab": vt,
        # Token tables fused with the input projections (gather == projection).
        "enc_tab": pad_cols(p["emb_src"] @ w_enc_e, Hp),   # (Vs, Hp) f32
        "dec_tab": pad_cols(p["emb_trg"] @ w_dec_e, Hp),   # (Vt, Hp) f32
        # Condition embedding projected once per condition id.
        "cn_enc":  pad_cols(p["emb_cn"] @ w_enc_c, Hp),    # (Vc, Hp) f32
        "cn_dec":  pad_cols(p["emb_cn"] @ w_dec_c, Hp),
        "b_enc":   pad_cols(p["b_enc"], Hp),
        "b_dec":   pad_cols(p["b_dec"], Hp),
        "w_clf":   pad_both(p["w_clf"], Hp, Cp).astype(jnp.bfloat16),
        "b_clf":   pad_cols(p["b_clf"], Cp),
        "w_gen":   pad_both(p["w_gen"], Hp, Vtp).astype(jnp.bfloat16),
        "b_gen":   pad_cols(p["b_gen"], Vtp),
    }


# ---------------------------------------------------------------------------
# Pure-JAX reference (f32) for a loose correctness check
# ---------------------------------------------------------------------------

def reference_forward(src, trg, src_mask, trg_mask, src_lengths, cn, p):
    src_e = p["emb_src"][src]                      # (B,S,E)
    trg_e = p["emb_trg"][trg]                      # (B,T,E)
    cn_e = p["emb_cn"][cn]                         # (B,Ec)
    B, S, _ = src_e.shape
    T = trg_e.shape[1]
    cn_src = jnp.broadcast_to(cn_e[:, None, :], (B, S, cn_e.shape[1]))
    cn_trg = jnp.broadcast_to(cn_e[:, None, :], (B, T, cn_e.shape[1]))
    hid = (jnp.concatenate([src_e, cn_src], -1) @ p["w_enc"] + p["b_enc"])
    hid = hid * src_mask[..., None].astype(jnp.float32)
    final = hid.sum(1) / jnp.maximum(src_lengths.astype(jnp.float32), 1.0)[:, None]
    clf = hid @ p["w_clf"] + p["b_clf"]
    pre = (jnp.concatenate([trg_e, cn_trg], -1) @ p["w_dec"] + p["b_dec"]
           + final[:, None, :])
    dec = (jnp.tanh(pre) @ p["w_gen"] + p["b_gen"]) * trg_mask[..., None].astype(jnp.float32)
    return dec, clf


# ---------------------------------------------------------------------------
# Demo
# ---------------------------------------------------------------------------

if __name__ == "__main__":
    B, S, T = 2, 8, 8
    SRC_VOCAB, TGT_VOCAB, CN_VOCAB = 32, 32, 4
    EMB, CN_EMB, HIDDEN, NUM_CLASSES = 32, 16, 32, 8

    root = jax.random.PRNGKey(0)
    k_src, k_trg, k_cn, k_par = jax.random.split(root, 4)

    src = jax.random.randint(k_src, (B, S), 0, SRC_VOCAB, dtype=jnp.int32)
    trg = jax.random.randint(k_trg, (B, T), 0, TGT_VOCAB, dtype=jnp.int32)
    cn = jax.random.randint(k_cn, (B,), 0, CN_VOCAB, dtype=jnp.int32)

    src_lengths = jnp.array([S, S - 2], dtype=jnp.int32)
    trg_lengths = jnp.array([T, T - 1], dtype=jnp.int32)
    src_mask = (jnp.arange(S)[None, :] < src_lengths[:, None]).astype(jnp.float32)
    trg_mask = (jnp.arange(T)[None, :] < trg_lengths[:, None]).astype(jnp.float32)

    params = init_params(k_par, SRC_VOCAB, TGT_VOCAB, CN_VOCAB, EMB, CN_EMB,
                         HIDDEN, NUM_CLASSES)
    prepped = prepare_params(params)

    dec_out, clf_logits = conditional_encoder_decoder_forward(
        src, trg, src_mask, trg_mask, src_lengths, trg_lengths, cn, prepped)
    jax.block_until_ready((dec_out, clf_logits))

    assert dec_out.shape == (B, T, TGT_VOCAB)
    assert clf_logits.shape == (B, S, NUM_CLASSES)
    assert bool(jnp.all(jnp.isfinite(dec_out)))
    assert bool(jnp.all(jnp.isfinite(clf_logits)))

    dec_ref, clf_ref = reference_forward(src, trg, src_mask, trg_mask,
                                         src_lengths, cn, params)
    assert float(jnp.max(jnp.abs(dec_out - dec_ref))) < 2e-2
    assert float(jnp.max(jnp.abs(clf_logits - clf_ref))) < 2e-2
    print("KERNEL_OK")
</pallas_src>

<mosaic_0001>
module attributes {stable_mosaic.version = 11 : i64} {
  func.func @fused_kernel(%arg0: i32, %arg1: memref<16xi32, #tpu.memory_space<smem>>, %arg2: memref<16xi32, #tpu.memory_space<smem>>, %arg3: memref<2xi32, #tpu.memory_space<smem>>, %arg4: memref<1x8x1xf32, #tpu.memory_space<vmem>>, %arg5: memref<1x8x1xf32, #tpu.memory_space<vmem>>, %arg6: memref<1x8x1xf32, #tpu.memory_space<vmem>>, %arg7: memref<32x128xf32, #tpu.memory_space<vmem>>, %arg8: memref<4x128xf32, #tpu.memory_space<vmem>>, %arg9: memref<1x128xf32, #tpu.memory_space<vmem>>, %arg10: memref<128x128xbf16, #tpu.memory_space<vmem>>, %arg11: memref<1x128xf32, #tpu.memory_space<vmem>>, %arg12: memref<32x128xf32, #tpu.memory_space<vmem>>, %arg13: memref<4x128xf32, #tpu.memory_space<vmem>>, %arg14: memref<1x128xf32, #tpu.memory_space<vmem>>, %arg15: memref<128x128xbf16, #tpu.memory_space<vmem>>, %arg16: memref<1x128xf32, #tpu.memory_space<vmem>>, %arg17: memref<1x8x128xf32, #tpu.memory_space<vmem>>, %arg18: memref<1x8x128xf32, #tpu.memory_space<vmem>>) attributes {dimension_semantics = [#tpu.dimension_semantics<parallel>], iteration_bounds = array<i64: 2>, scalar_prefetch = 3 : i64, scratch_operands = 0 : i64, tpu.core_type = #tpu.core_type<tc>, window_params = [{transform_indices = @transform_0, window_bounds = array<i64: 1, 8, 1>}, {transform_indices = @transform_1, window_bounds = array<i64: 1, 8, 1>}, {transform_indices = @transform_2, window_bounds = array<i64: 1, 8, 1>}, {pipeline_mode = #tpu.pipeline_mode<synchronous>, transform_indices = @transform_3, window_bounds = array<i64: 32, 128>}, {pipeline_mode = #tpu.pipeline_mode<synchronous>, transform_indices = @transform_4, window_bounds = array<i64: 4, 128>}, {pipeline_mode = #tpu.pipeline_mode<synchronous>, transform_indices = @transform_5, window_bounds = array<i64: 1, 128>}, {pipeline_mode = #tpu.pipeline_mode<synchronous>, transform_indices = @transform_6, window_bounds = array<i64: 128, 128>}, {pipeline_mode = #tpu.pipeline_mode<synchronous>, transform_indices = @transform_7, window_bounds = array<i64: 1, 128>}, {pipeline_mode = #tpu.pipeline_mode<synchronous>, transform_indices = @transform_8, window_bounds = array<i64: 32, 128>}, {pipeline_mode = #tpu.pipeline_mode<synchronous>, transform_indices = @transform_9, window_bounds = array<i64: 4, 128>}, {pipeline_mode = #tpu.pipeline_mode<synchronous>, transform_indices = @transform_10, window_bounds = array<i64: 1, 128>}, {pipeline_mode = #tpu.pipeline_mode<synchronous>, transform_indices = @transform_11, window_bounds = array<i64: 128, 128>}, {pipeline_mode = #tpu.pipeline_mode<synchronous>, transform_indices = @transform_12, window_bounds = array<i64: 1, 128>}, {transform_indices = @transform_13, window_bounds = array<i64: 1, 8, 128>}, {transform_indices = @transform_14, window_bounds = array<i64: 1, 8, 128>}]} {
    %0 = arith.index_cast %arg0 : i32 to index
    %1 = memref.load %arg3[%0] : memref<2xi32, #tpu.memory_space<smem>>
    %2 = arith.index_cast %1 : i32 to index
    %c0 = arith.constant 0 : index
    %3 = vector.load %arg8[%2, %c0] : memref<4x128xf32, #tpu.memory_space<vmem>>, vector<1x128xf32>
    %c0_0 = arith.constant 0 : index
    %c0_1 = arith.constant 0 : index
    %4 = vector.load %arg9[%c0_0, %c0_1] : memref<1x128xf32, #tpu.memory_space<vmem>>, vector<1x128xf32>
    %5 = arith.addf %3, %4 : vector<1x128xf32>
    %c8_i32 = arith.constant 8 : i32
    %6 = arith.muli %arg0, %c8_i32 : i32
    %c0_i32 = arith.constant 0 : i32
    %7 = arith.addi %6, %c0_i32 : i32
    %8 = arith.index_cast %7 : i32 to index
    %9 = memref.load %arg1[%8] : memref<16xi32, #tpu.memory_space<smem>>
    %10 = arith.index_cast %9 : i32 to index
    %c0_2 = arith.constant 0 : index
    %11 = vector.load %arg7[%10, %c0_2] : memref<32x128xf32, #tpu.memory_space<vmem>>, vector<1x128xf32>
    %c1_i32 = arith.constant 1 : i32
    %12 = arith.addi %6, %c1_i32 : i32
    %13 = arith.index_cast %12 : i32 to index
    %14 = memref.load %arg1[%13] : memref<16xi32, #tpu.memory_space<smem>>
    %15 = arith.index_cast %14 : i32 to index
    %c0_3 = arith.constant 0 : index
    %16 = vector.load %arg7[%15, %c0_3] : memref<32x128xf32, #tpu.memory_space<vmem>>, vector<1x128xf32>
    %c2_i32 = arith.constant 2 : i32
    %17 = arith.addi %6, %c2_i32 : i32
    %18 = arith.index_cast %17 : i32 to index
    %19 = memref.load %arg1[%18] : memref<16xi32, #tpu.memory_space<smem>>
    %20 = arith.index_cast %19 : i32 to index
    %c0_4 = arith.constant 0 : index
    %21 = vector.load %arg7[%20, %c0_4] : memref<32x128xf32, #tpu.memory_space<vmem>>, vector<1x128xf32>
    %c3_i32 = arith.constant 3 : i32
    %22 = arith.addi %6, %c3_i32 : i32
    %23 = arith.index_cast %22 : i32 to index
    %24 = memref.load %arg1[%23] : memref<16xi32, #tpu.memory_space<smem>>
    %25 = arith.index_cast %24 : i32 to index
    %c0_5 = arith.constant 0 : index
    %26 = vector.load %arg7[%25, %c0_5] : memref<32x128xf32, #tpu.memory_space<vmem>>, vector<1x128xf32>
    %c4_i32 = arith.constant 4 : i32
    %27 = arith.addi %6, %c4_i32 : i32
    %28 = arith.index_cast %27 : i32 to index
    %29 = memref.load %arg1[%28] : memref<16xi32, #tpu.memory_space<smem>>
    %30 = arith.index_cast %29 : i32 to index
    %c0_6 = arith.constant 0 : index
    %31 = vector.load %arg7[%30, %c0_6] : memref<32x128xf32, #tpu.memory_space<vmem>>, vector<1x128xf32>
    %c5_i32 = arith.constant 5 : i32
    %32 = arith.addi %6, %c5_i32 : i32
    %33 = arith.index_cast %32 : i32 to index
    %34 = memref.load %arg1[%33] : memref<16xi32, #tpu.memory_space<smem>>
    %35 = arith.index_cast %34 : i32 to index
    %c0_7 = arith.constant 0 : index
    %36 = vector.load %arg7[%35, %c0_7] : memref<32x128xf32, #tpu.memory_space<vmem>>, vector<1x128xf32>
    %c6_i32 = arith.constant 6 : i32
    %37 = arith.addi %6, %c6_i32 : i32
    %38 = arith.index_cast %37 : i32 to index
    %39 = memref.load %arg1[%38] : memref<16xi32, #tpu.memory_space<smem>>
    %40 = arith.index_cast %39 : i32 to index
    %c0_8 = arith.constant 0 : index
    %41 = vector.load %arg7[%40, %c0_8] : memref<32x128xf32, #tpu.memory_space<vmem>>, vector<1x128xf32>
    %c7_i32 = arith.constant 7 : i32
    %42 = arith.addi %6, %c7_i32 : i32
    %43 = arith.index_cast %42 : i32 to index
    %44 = memref.load %arg1[%43] : memref<16xi32, #tpu.memory_space<smem>>
    %45 = arith.index_cast %44 : i32 to index
    %c0_9 = arith.constant 0 : index
    %46 = vector.load %arg7[%45, %c0_9] : memref<32x128xf32, #tpu.memory_space<vmem>>, vector<1x128xf32>
    %47 = tpu.concatenate %11, %16, %21, %26, %31, %36, %41, %46 in 0 : vector<1x128xf32>, vector<1x128xf32>, vector<1x128xf32>, vector<1x128xf32>, vector<1x128xf32>, vector<1x128xf32>, vector<1x128xf32>, vector<1x128xf32> -> vector<8x128xf32>
    %48 = vector.broadcast %5 : vector<1x128xf32> to vector<8x128xf32>
    %49 = arith.addf %47, %48 : vector<8x128xf32>
    %c0_10 = arith.constant 0 : index
    %c0_11 = arith.constant 0 : index
    %c0_12 = arith.constant 0 : index
    %50 = vector.load %arg4[%c0_10, %c0_11, %c0_12] : memref<1x8x1xf32, #tpu.memory_space<vmem>>, vector<1x8x1xf32>
    %51 = vector.shape_cast %50 : vector<1x8x1xf32> to vector<8x1xf32>
    %52 = vector.broadcast %51 : vector<8x1xf32> to vector<8x128xf32>
    %53 = arith.mulf %49, %52 : vector<8x128xf32>
    %c0_13 = arith.constant 0 : index
    %c0_14 = arith.constant 0 : index
    %c0_15 = arith.constant 0 : index
    %54 = vector.load %arg6[%c0_13, %c0_14, %c0_15] : memref<1x8x1xf32, #tpu.memory_space<vmem>>, vector<1x8x1xf32>
    %55 = vector.shape_cast %54 : vector<1x8x1xf32> to vector<8x1xf32>
    %56 = vector.broadcast %55 : vector<8x1xf32> to vector<8x128xf32>
    %57 = arith.mulf %49, %56 : vector<8x128xf32>
    %cst = arith.constant dense<0.000000e+00> : vector<128xf32>
    %58 = vector.multi_reduction <add>, %57, %cst [0] : vector<8x128xf32> to vector<128xf32>
    %59 = vector.shape_cast %58 : vector<128xf32> to vector<1x128xf32>
    %60 = arith.truncf %53 : vector<8x128xf32> to vector<8x128xbf16>
    %c0_16 = arith.constant 0 : index
    %c0_17 = arith.constant 0 : index
    %61 = vector.load %arg10[%c0_16, %c0_17] : memref<128x128xbf16, #tpu.memory_space<vmem>>, vector<128x128xbf16>
    %cst_18 = arith.constant dense<0.000000e+00> : vector<8x128xf32>
    %62 = tpu.matmul %60, %61, %cst_18 {dimension_numbers = #tpu.dot_dimension_numbers<[1], [0], [0], [1], [0, 0, 1, 1], [], []>} : vector<8x128xbf16>, vector<128x128xbf16>, vector<8x128xf32> -> vector<8x128xf32>
    %c0_19 = arith.constant 0 : index
    %c0_20 = arith.constant 0 : index
    %63 = vector.load %arg11[%c0_19, %c0_20] : memref<1x128xf32, #tpu.memory_space<vmem>>, vector<1x128xf32>
    %64 = vector.broadcast %63 : vector<1x128xf32> to vector<8x128xf32>
    %65 = arith.addf %62, %64 : vector<8x128xf32>
    %c0_21 = arith.constant 0 : index
    %c0_22 = arith.constant 0 : index
    %c0_23 = arith.constant 0 : index
    %66 = vector.load %arg17[%c0_21, %c0_22, %c0_23] : memref<1x8x128xf32, #tpu.memory_space<vmem>>, vector<1x8x128xf32>
    %67 = vector.shape_cast %66 : vector<1x8x128xf32> to vector<8x128xf32>
    %68 = vector.shape_cast %65 : vector<8x128xf32> to vector<1x8x128xf32>
    tpu.vector_store %arg17[%c0_21, %c0_22, %c0_23], %68 {strides = array<i32>} : memref<1x8x128xf32, #tpu.memory_space<vmem>>, vector<1x8x128xf32>,
    %69 = arith.index_cast %1 : i32 to index
    %c0_24 = arith.constant 0 : index
    %70 = vector.load %arg13[%69, %c0_24] : memref<4x128xf32, #tpu.memory_space<vmem>>, vector<1x128xf32>
    %c0_25 = arith.constant 0 : index
    %c0_26 = arith.constant 0 : index
    %71 = vector.load %arg14[%c0_25, %c0_26] : memref<1x128xf32, #tpu.memory_space<vmem>>, vector<1x128xf32>
    %72 = arith.addf %70, %71 : vector<1x128xf32>
    %73 = arith.addf %72, %59 : vector<1x128xf32>
    %c8_i32_27 = arith.constant 8 : i32
    %74 = arith.muli %arg0, %c8_i32_27 : i32
    %c0_i32_28 = arith.constant 0 : i32
    %75 = arith.addi %74, %c0_i32_28 : i32
    %76 = arith.index_cast %75 : i32 to index
    %77 = memref.load %arg2[%76] : memref<16xi32, #tpu.memory_space<smem>>
    %78 = arith.index_cast %77 : i32 to index
    %c0_29 = arith.constant 0 : index
    %79 = vector.load %arg12[%78, %c0_29] : memref<32x128xf32, #tpu.memory_space<vmem>>, vector<1x128xf32>
    %c1_i32_30 = arith.constant 1 : i32
    %80 = arith.addi %74, %c1_i32_30 : i32
    %81 = arith.index_cast %80 : i32 to index
    %82 = memref.load %arg2[%81] : memref<16xi32, #tpu.memory_space<smem>>
    %83 = arith.index_cast %82 : i32 to index
    %c0_31 = arith.constant 0 : index
    %84 = vector.load %arg12[%83, %c0_31] : memref<32x128xf32, #tpu.memory_space<vmem>>, vector<1x128xf32>
    %c2_i32_32 = arith.constant 2 : i32
    %85 = arith.addi %74, %c2_i32_32 : i32
    %86 = arith.index_cast %85 : i32 to index
    %87 = memref.load %arg2[%86] : memref<16xi32, #tpu.memory_space<smem>>
    %88 = arith.index_cast %87 : i32 to index
    %c0_33 = arith.constant 0 : index
    %89 = vector.load %arg12[%88, %c0_33] : memref<32x128xf32, #tpu.memory_space<vmem>>, vector<1x128xf32>
    %c3_i32_34 = arith.constant 3 : i32
    %90 = arith.addi %74, %c3_i32_34 : i32
    %91 = arith.index_cast %90 : i32 to index
    %92 = memref.load %arg2[%91] : memref<16xi32, #tpu.memory_space<smem>>
    %93 = arith.index_cast %92 : i32 to index
    %c0_35 = arith.constant 0 : index
    %94 = vector.load %arg12[%93, %c0_35] : memref<32x128xf32, #tpu.memory_space<vmem>>, vector<1x128xf32>
    %c4_i32_36 = arith.constant 4 : i32
    %95 = arith.addi %74, %c4_i32_36 : i32
    %96 = arith.index_cast %95 : i32 to index
    %97 = memref.load %arg2[%96] : memref<16xi32, #tpu.memory_space<smem>>
    %98 = arith.index_cast %97 : i32 to index
    %c0_37 = arith.constant 0 : index
    %99 = vector.load %arg12[%98, %c0_37] : memref<32x128xf32, #tpu.memory_space<vmem>>, vector<1x128xf32>
    %c5_i32_38 = arith.constant 5 : i32
    %100 = arith.addi %74, %c5_i32_38 : i32
    %101 = arith.index_cast %100 : i32 to index
    %102 = memref.load %arg2[%101] : memref<16xi32, #tpu.memory_space<smem>>
    %103 = arith.index_cast %102 : i32 to index
    %c0_39 = arith.constant 0 : index
    %104 = vector.load %arg12[%103, %c0_39] : memref<32x128xf32, #tpu.memory_space<vmem>>, vector<1x128xf32>
    %c6_i32_40 = arith.constant 6 : i32
    %105 = arith.addi %74, %c6_i32_40 : i32
    %106 = arith.index_cast %105 : i32 to index
    %107 = memref.load %arg2[%106] : memref<16xi32, #tpu.memory_space<smem>>
    %108 = arith.index_cast %107 : i32 to index
    %c0_41 = arith.constant 0 : index
    %109 = vector.load %arg12[%108, %c0_41] : memref<32x128xf32, #tpu.memory_space<vmem>>, vector<1x128xf32>
    %c7_i32_42 = arith.constant 7 : i32
    %110 = arith.addi %74, %c7_i32_42 : i32
    %111 = arith.index_cast %110 : i32 to index
    %112 = memref.load %arg2[%111] : memref<16xi32, #tpu.memory_space<smem>>
    %113 = arith.index_cast %112 : i32 to index
    %c0_43 = arith.constant 0 : index
    %114 = vector.load %arg12[%113, %c0_43] : memref<32x128xf32, #tpu.memory_space<vmem>>, vector<1x128xf32>
    %115 = tpu.concatenate %79, %84, %89, %94, %99, %104, %109, %114 in 0 : vector<1x128xf32>, vector<1x128xf32>, vector<1x128xf32>, vector<1x128xf32>, vector<1x128xf32>, vector<1x128xf32>, vector<1x128xf32>, vector<1x128xf32> -> vector<8x128xf32>
    %116 = vector.broadcast %73 : vector<1x128xf32> to vector<8x128xf32>
    %117 = arith.addf %115, %116 : vector<8x128xf32>
    %118 = math.tanh %117 : vector<8x128xf32>
    %c0_44 = arith.constant 0 : index
    %c0_45 = arith.constant 0 : index
    %c0_46 = arith.constant 0 : index
    %119 = vector.load %arg5[%c0_44, %c0_45, %c0_46] : memref<1x8x1xf32, #tpu.memory_space<vmem>>, vector<1x8x1xf32>
    %120 = vector.shape_cast %119 : vector<1x8x1xf32> to vector<8x1xf32>
    %121 = arith.truncf %118 : vector<8x128xf32> to vector<8x128xbf16>
    %c0_47 = arith.constant 0 : index
    %c0_48 = arith.constant 0 : index
    %122 = vector.load %arg15[%c0_47, %c0_48] : memref<128x128xbf16, #tpu.memory_space<vmem>>, vector<128x128xbf16>
    %cst_49 = arith.constant dense<0.000000e+00> : vector<8x128xf32>
    %123 = tpu.matmul %121, %122, %cst_49 {dimension_numbers = #tpu.dot_dimension_numbers<[1], [0], [0], [1], [0, 0, 1, 1], [], []>} : vector<8x128xbf16>, vector<128x128xbf16>, vector<8x128xf32> -> vector<8x128xf32>
    %c0_50 = arith.constant 0 : index
    %c0_51 = arith.constant 0 : index
    %124 = vector.load %arg16[%c0_50, %c0_51] : memref<1x128xf32, #tpu.memory_space<vmem>>, vector<1x128xf32>
    %125 = vector.broadcast %124 : vector<1x128xf32> to vector<8x128xf32>
    %126 = arith.addf %123, %125 : vector<8x128xf32>
    %127 = vector.broadcast %120 : vector<8x1xf32> to vector<8x128xf32>
    %128 = arith.mulf %126, %127 : vector<8x128xf32>
    %c0_52 = arith.constant 0 : index
    %c0_53 = arith.constant 0 : index
    %c0_54 = arith.constant 0 : index
    %129 = vector.load %arg18[%c0_52, %c0_53, %c0_54] : memref<1x8x128xf32, #tpu.memory_space<vmem>>, vector<1x8x128xf32>
    %130 = vector.shape_cast %129 : vector<1x8x128xf32> to vector<8x128xf32>
    %131 = vector.shape_cast %128 : vector<8x128xf32> to vector<1x8x128xf32>
    tpu.vector_store %arg18[%c0_52, %c0_53, %c0_54], %131 {strides = array<i32>} : memref<1x8x128xf32, #tpu.memory_space<vmem>>, vector<1x8x128xf32>,
    return
  }
  func.func @transform_0(%arg0: i32, %arg1: memref<16xi32, #tpu.memory_space<smem>>, %arg2: memref<16xi32, #tpu.memory_space<smem>>, %arg3: memref<2xi32, #tpu.memory_space<smem>>) -> (i32, i32, i32) {
    %c0_i32 = arith.constant 0 : i32
    %c0_i32_0 = arith.constant 0 : i32
    %c0_i32_1 = arith.constant 0 : i32
    return %arg0, %c0_i32, %c0_i32_0 : i32, i32, i32
  }
  func.func @transform_1(%arg0: i32, %arg1: memref<16xi32, #tpu.memory_space<smem>>, %arg2: memref<16xi32, #tpu.memory_space<smem>>, %arg3: memref<2xi32, #tpu.memory_space<smem>>) -> (i32, i32, i32) {
    %c0_i32 = arith.constant 0 : i32
    %c0_i32_0 = arith.constant 0 : i32
    %c0_i32_1 = arith.constant 0 : i32
    return %arg0, %c0_i32, %c0_i32_0 : i32, i32, i32
  }
  func.func @transform_2(%arg0: i32, %arg1: memref<16xi32, #tpu.memory_space<smem>>, %arg2: memref<16xi32, #tpu.memory_space<smem>>, %arg3: memref<2xi32, #tpu.memory_space<smem>>) -> (i32, i32, i32) {
    %c0_i32 = arith.constant 0 : i32
    %c0_i32_0 = arith.constant 0 : i32
    %c0_i32_1 = arith.constant 0 : i32
    return %arg0, %c0_i32, %c0_i32_0 : i32, i32, i32
  }
  func.func @transform_3(%arg0: i32, %arg1: memref<16xi32, #tpu.memory_space<smem>>, %arg2: memref<16xi32, #tpu.memory_space<smem>>, %arg3: memref<2xi32, #tpu.memory_space<smem>>) -> (i32, i32) {
    %c0_i32 = arith.constant 0 : i32
    %c0_i32_0 = arith.constant 0 : i32
    %c0_i32_1 = arith.constant 0 : i32
    return %c0_i32, %c0_i32_0 : i32, i32
  }
  func.func @transform_4(%arg0: i32, %arg1: memref<16xi32, #tpu.memory_space<smem>>, %arg2: memref<16xi32, #tpu.memory_space<smem>>, %arg3: memref<2xi32, #tpu.memory_space<smem>>) -> (i32, i32) {
    %c0_i32 = arith.constant 0 : i32
    %c0_i32_0 = arith.constant 0 : i32
    %c0_i32_1 = arith.constant 0 : i32
    return %c0_i32, %c0_i32_0 : i32, i32
  }
  func.func @transform_5(%arg0: i32, %arg1: memref<16xi32, #tpu.memory_space<smem>>, %arg2: memref<16xi32, #tpu.memory_space<smem>>, %arg3: memref<2xi32, #tpu.memory_space<smem>>) -> (i32, i32) {
    %c0_i32 = arith.constant 0 : i32
    %c0_i32_0 = arith.constant 0 : i32
    %c0_i32_1 = arith.constant 0 : i32
    return %c0_i32, %c0_i32_0 : i32, i32
  }
  func.func @transform_6(%arg0: i32, %arg1: memref<16xi32, #tpu.memory_space<smem>>, %arg2: memref<16xi32, #tpu.memory_space<smem>>, %arg3: memref<2xi32, #tpu.memory_space<smem>>) -> (i32, i32) {
    %c0_i32 = arith.constant 0 : i32
    %c0_i32_0 = arith.constant 0 : i32
    %c0_i32_1 = arith.constant 0 : i32
    return %c0_i32, %c0_i32_0 : i32, i32
  }
  func.func @transform_7(%arg0: i32, %arg1: memref<16xi32, #tpu.memory_space<smem>>, %arg2: memref<16xi32, #tpu.memory_space<smem>>, %arg3: memref<2xi32, #tpu.memory_space<smem>>) -> (i32, i32) {
    %c0_i32 = arith.constant 0 : i32
    %c0_i32_0 = arith.constant 0 : i32
    %c0_i32_1 = arith.constant 0 : i32
    return %c0_i32, %c0_i32_0 : i32, i32
  }
  func.func @transform_8(%arg0: i32, %arg1: memref<16xi32, #tpu.memory_space<smem>>, %arg2: memref<16xi32, #tpu.memory_space<smem>>, %arg3: memref<2xi32, #tpu.memory_space<smem>>) -> (i32, i32) {
    %c0_i32 = arith.constant 0 : i32
    %c0_i32_0 = arith.constant 0 : i32
    %c0_i32_1 = arith.constant 0 : i32
    return %c0_i32, %c0_i32_0 : i32, i32
  }
  func.func @transform_9(%arg0: i32, %arg1: memref<16xi32, #tpu.memory_space<smem>>, %arg2: memref<16xi32, #tpu.memory_space<smem>>, %arg3: memref<2xi32, #tpu.memory_space<smem>>) -> (i32, i32) {
    %c0_i32 = arith.constant 0 : i32
    %c0_i32_0 = arith.constant 0 : i32
    %c0_i32_1 = arith.constant 0 : i32
    return %c0_i32, %c0_i32_0 : i32, i32
  }
  func.func @transform_10(%arg0: i32, %arg1: memref<16xi32, #tpu.memory_space<smem>>, %arg2: memref<16xi32, #tpu.memory_space<smem>>, %arg3: memref<2xi32, #tpu.memory_space<smem>>) -> (i32, i32) {
    %c0_i32 = arith.constant 0 : i32
    %c0_i32_0 = arith.constant 0 : i32
    %c0_i32_1 = arith.constant 0 : i32
    return %c0_i32, %c0_i32_0 : i32, i32
  }
  func.func @transform_11(%arg0: i32, %arg1: memref<16xi32, #tpu.memory_space<smem>>, %arg2: memref<16xi32, #tpu.memory_space<smem>>, %arg3: memref<2xi32, #tpu.memory_space<smem>>) -> (i32, i32) {
    %c0_i32 = arith.constant 0 : i32
    %c0_i32_0 = arith.constant 0 : i32
    %c0_i32_1 = arith.constant 0 : i32
    return %c0_i32, %c0_i32_0 : i32, i32
  }
  func.func @transform_12(%arg0: i32, %arg1: memref<16xi32, #tpu.memory_space<smem>>, %arg2: memref<16xi32, #tpu.memory_space<smem>>, %arg3: memref<2xi32, #tpu.memory_space<smem>>) -> (i32, i32) {
    %c0_i32 = arith.constant 0 : i32
    %c0_i32_0 = arith.constant 0 : i32
    %c0_i32_1 = arith.constant 0 : i32
    return %c0_i32, %c0_i32_0 : i32, i32
  }
  func.func @transform_13(%arg0: i32, %arg1: memref<16xi32, #tpu.memory_space<smem>>, %arg2: memref<16xi32, #tpu.memory_space<smem>>, %arg3: memref<2xi32, #tpu.memory_space<smem>>) -> (i32, i32, i32) {
    %c0_i32 = arith.constant 0 : i32
    %c0_i32_0 = arith.constant 0 : i32
    %c0_i32_1 = arith.constant 0 : i32
    return %arg0, %c0_i32, %c0_i32_0 : i32, i32, i32
  }
  func.func @transform_14(%arg0: i32, %arg1: memref<16xi32, #tpu.memory_space<smem>>, %arg2: memref<16xi32, #tpu.memory_space<smem>>, %arg3: memref<2xi32, #tpu.memory_space<smem>>) -> (i32, i32, i32) {
    %c0_i32 = arith.constant 0 : i32
    %c0_i32_0 = arith.constant 0 : i32
    %c0_i32_1 = arith.constant 0 : i32
    return %arg0, %c0_i32, %c0_i32_0 : i32, i32, i32
  }
}

</mosaic_0001>

<bundles_post_ra>
// kernel: tpu_custom_call.1
= control target key start
LH: loop header
LB: loop body
LE: loop exit
PB: predicated region body
PF: predicated region fallthrough
CT: control target
= control target key end

     0   :  { %s1684_s24 = smov [#allocation3]   ;;  %s1685_s27 = smov [#allocation4]   ;;  %s2129_s0 = inlined_call_operand.hbm [shape: s32[16], index: 0, kind: input, shape index: {}]   ;;  %s2130_s3 = inlined_call_operand.vmem [shape: f32[2,8,1], index: 3, kind: input, shape index: {}]   ;;  %s2131_s4 = inlined_call_operand.vmem [shape: f32[2,8,1], index: 4, kind: input, shape index: {}]   ;;  %s2132_s5 = inlined_call_operand.vmem [shape: f32[2,8,1], index: 5, kind: input, shape index: {}]   ;;  %s2133_s6 = inlined_call_operand.hbm [shape: f32[32,128], index: 6, kind: input, shape index: {}]   ;;  %s2134_s7 = inlined_call_operand.vmem [shape: f32[4,128], index: 7, kind: input, shape index: {}]   ;;  %s2135_s8 = inlined_call_operand.hbm [shape: f32[1,128], index: 8, kind: input, shape index: {}]   ;;  %s2136_s9 = inlined_call_operand.vmem [shape: bf16[128,128], index: 9, kind: input, shape index: {}]   ;;  %s2137_s10 = inlined_call_operand.hbm [shape: f32[1,128], index: 10, kind: input, shape index: {}]   ;;  %s2138_s11 = inlined_call_operand.hbm [shape: f32[32,128], index: 11, kind: input, shape index: {}]   ;;  %s2139_s12 = inlined_call_operand.vmem [shape: f32[4,128], index: 12, kind: input, shape index: {}]   ;;  %s2140_s13 = inlined_call_operand.vmem [shape: f32[1,128], index: 13, kind: input, shape index: {}]   ;;  %s2141_s14 = inlined_call_operand.hbm [shape: bf16[128,128], index: 14, kind: input, shape index: {}]   ;;  %s2142_s15 = inlined_call_operand.vmem [shape: f32[1,128], index: 15, kind: input, shape index: {}]   ;;  %s2143_s16 = inlined_call_operand.hbm [shape: f32[2,8,128], index: 16, kind: output, shape index: {0}]   ;;  %s2144_s17 = inlined_call_operand.hbm [shape: f32[2,8,128], index: 17, kind: output, shape index: {1}]   ;;  %s2145_s1 = inlined_call_operand.hbm [shape: s32[16], index: 1, kind: input, shape index: {}]   ;;  %s2146_s2 = inlined_call_operand.hbm [shape: s32[2], index: 2, kind: input, shape index: {}]  }
   0x1   :  { %2158 = sst [smem:[#allocation27_spill]] %s2129_s0  ;;  %s1686_s0 = smov [#allocation5]  }
   0x2   :  { %2159 = sst [smem:[#allocation28_spill]] %s2130_s3 }
   0x3   :  { %2160 = sst [smem:[#allocation29_spill]] %s2131_s4 }
   0x4   :  { %2161 = sst [smem:[#allocation30_spill]] %s2132_s5 }
   0x5   :  { %2162 = sst [smem:[#allocation31_spill]] %s2133_s6 }
   0x6   :  { %2163 = sst [smem:[#allocation32_spill]] %s2135_s8 }
   0x7   :  { %2164 = sst [smem:[#allocation33_spill]] %s2138_s11 }
   0x8   :  { %2165 = sst [smem:[#allocation34_spill]] %s2140_s13 }
   0x9   :  { %s2166_s13 = sld [smem:[#allocation27_spill]] }
   0xf   :  { %24 = dma.hbm_to_smem %s2166_s13, 16, %s1684_s24, [#allocation2] }
  0x10   :  { %26 = dma.hbm_to_smem %s2145_s1, 16, %s1685_s27, [#allocation2] }
  0x11   :  { %28 = dma.hbm_to_smem %s2146_s2, 16, %s1686_s0, [#allocation2] }
  0x12   :  { %1646 = dma.done.wait [#allocation2], 48 }
  0x13   :  { %1647 = vsyncadd [#allocation2], 4294967248 }
  0x14   :  { %30 = sfence }
  0x15   :  { %31 = vsyncpa [#allocation7], 0 }
  0x16   :  { %32 = vsyncpa [#allocation10], 0 }
  0x17   :  { %33 = vsyncpa [#allocation13], 0 }
  0x18   :  { %34 = vsyncpa [#allocation8], 0 }
  0x19   :  { %36 = vsyncpa [#allocation8 + $0x1], 0 }
  0x1a   :  { %37 = vsyncpa [#allocation17], 0 }
  0x1b   :  { %39 = vsyncpa [#allocation17 + $0x1], 0  ;;  %s1800_s13 = smov 0   ;;  %s1802_s19 = smov 0  }
  0x1c   :  { %s1804_s1 = smov 0   ;;  %s1806_s3 = smov 0  }
  0x1d LB: > { %2167 = sst [smem:[#allocation24_spill]] %s1678_s1  ;;  %s1821_s2 = sadd.s32 4294967295, %s1682_s3   ;;  %s1682_s3 = sphi %s1806_s3, %s2196_s3   ;;  %s1678_s1 = sphi %s1804_s1, %s2198_s1   ;;  %s1674_s19 = sphi %s1802_s19, %s2200_s19   ;;  %s1670_s13 = sphi %s1800_s13, %s2199_s13  }
  0x1e   : > { %s1197_s20 = sadd.s32 4294967294, %s1682_s3   ;;  %s1825_s21 = sadd.s32 1, %s1682_s3  }
  0x1f   : > { %2168 = sst [smem:[#allocation25_spill]] %s1825_s21  ;;  %s340_s22 = sadd.s32 1, %s1678_s1 }
  0x20   : > { %s337_s23 = ssub.s32 %s1682_s3, %s1825_s21  ;;  %p350_p0 = scmp.ne.s32.totalorder %s1678_s1, %s1674_s19 }
  0x21   : > { %p338_p1 = scmp.eq.s32.totalorder %s337_s23, 0  ;;  %p351_p2 = scmp.eq.s32.totalorder %s1821_s2, 1 }
  0x22   : > { %p356_p3 = scmp.ne.s32.totalorder %s1674_s19, %s1670_s13  ;;  %p357_p4 = scmp.eq.s32.totalorder %s1197_s20, 1 }
  0x23   : > { %s1836_s24 = scalar_select %p338_p1, %s1678_s1, %s340_s22  }
  0x24   : > { %p1838_p5 = por %p351_p2, %p350_p0  ;;  %p1842_p6 = por %p357_p4, %p356_p3 }
  0x25   : > { %2169 = sst [smem:[#allocation26_spill]] %s1836_s24  ;;  %p1198_p7 = scmp.ge.s32.totalorder %s1682_s3, 1 }
  0x26   : > { %s2170_s25 = scalar_select %p1838_p5, 1, 0 }
  0x27   : > { %s2171_s26 = scalar_select %p1842_p6, 1, 0 }
  0x28   : > { %p390_p8 = scmp.lt.s32.totalorder %s1682_s3, 3  ;;  %p2148_p9 = scmp.eq.s32.totalorder %s1821_s2, 0 }
  0x29   : > { %s1687_s28 = smov [#allocation9]   ;;  %s1688_s30 = smov [#allocation12]  }
  0x2a   : > { %p1849_p10 = pnand %p1198_p7, %p390_p8  ;;  %s419_s29 = sshll.u32 %s1687_s28, 4  ;;  %s420_s29 = int_to_ptr.vmem [resolvable:$true] %s419_s29 }
  0x2b   : > { %s443_s18 = sshll.u32 %s1688_s30, 4  ;;  %s1689_s20 = smov [#allocation6]   ;;  %s1861_s18 = int_to_ptr.vmem [resolvable:$true] %s443_s18 }
  0x2c   : > { %s2172_s27 = scalar_select %p1849_p10, 1, 0 }
  0x2d   : > { %p1323_p11 = pneg %p1849_p10  ;;  %s402_s22 = sshll.u32 %s1689_s20, 4  ;;  %s403_s22 = int_to_ptr.vmem [resolvable:$true] %s402_s22 }
  0x2e   : > { %s1459_s28 = scalar_lea.vmem %s420_s29, 16  ;;  %s1466_s24 = scalar_lea.vmem %s420_s29, 32 }
  0x2f   : > { %p1857_p12 = pnand %p2148_p9, %p1323_p11  ;;  %p1460_p0 = scmp.ne.s32.totalorder %s420_s29, %s1459_s28 }
  0x30   : > { %p1467_p3 = scmp.lt.s32.totalorder %s420_s29, %s420_s29  ;;  %p1468_p4 = scmp.lt.s32.totalorder %s1466_s24, %s1459_s28 }
  0x31   : > { %p1865_p13 = pneg %p1857_p12 }
  0x32   : > { %p1469_p7 = por %p1468_p4, %p1467_p3 }
  0x33   : > { %p1462_p1 = pnand %p1460_p0, %p1865_p13 }
  0x35   : > { %p1463_p2 = pneg %p1462_p1 }
  0x37   : > { %p1470_p8 = pnand %p1469_p7, %p1463_p2 }
  0x39   : > { %1473 = shalt.err (!%p1470_p8)
}
  0x3a   : > { %s2175_s8 = sld [smem:[#allocation32_spill]]  ;;  %s1485_s1 = scalar_lea.vmem %s1861_s18, 512 }
  0x3b   : > { %p1486_p11 = scmp.ne.s32.totalorder %s1861_s18, %s1485_s1  ;;  %p1493_p9 = scmp.lt.s32.totalorder %s1861_s18, %s1861_s18 }
  0x3c   : > { %p1494_p3 = scmp.lt.s32.totalorder %s1485_s1, %s1485_s1 }
  0x3d   : > { %p1488_p0 = pnand %p1486_p11, %p1865_p13 }
  0x3e   : > { %p1495_p2 = por %p1494_p3, %p1493_p9 }
  0x3f   : > { %p1489_p1 = pneg %p1488_p0 }
  0x40   : > { %1329 = dma.hbm_to_vmem [thread:$0]  (!%p1857_p12), %s2175_s8, 16, %s420_s29, [#allocation10]  }
  0x41   : > { %p1496_p4 = pnand %p1495_p2, %p1489_p1 }
  0x43   : > { %1499 = shalt.err (!%p1496_p4)
}
  0x44   : > { %s1690_s24 = smov 128   ;;  %s1691_s28 = smov 8  }
  0x45   : > { %s2176_s11 = sld [smem:[#allocation33_spill]]  ;;  %s1511_s29 = scalar_lea.vmem %s403_s22, 512 }
  0x46   : > { %p1512_p7 = scmp.ne.s32.totalorder %s403_s22, %s1511_s29  ;;  %p1519_p0 = scmp.lt.s32.totalorder %s403_s22, %s403_s22 }
  0x47   : > { %p1520_p9 = scmp.lt.s32.totalorder %s1511_s29, %s1511_s29 }
  0x48   : > { %p1514_p8 = pnand %p1512_p7, %p1865_p13 }
  0x49   : > { %p1521_p1 = por %p1520_p9, %p1519_p0 }
  0x4a   : > { %p1515_p11 = pneg %p1514_p8 }
  0x4b   : > { %1335 = dma.hbm_to_vmem [thread:$0]  (!%p1857_p12), %s2176_s11, 512, %s1861_s18, [#allocation13], %s1690_s24, %s1690_s24, %s1691_s28  }
  0x4c   : > { %p1522_p3 = pnand %p1521_p1, %p1515_p11 }
  0x4e   : > { %1525 = shalt.err (!%p1522_p3)
}
  0x4f   : > { %s2177_s6 = sld [smem:[#allocation31_spill]]  ;;  %s1692_s30 = smov [#allocation11]  }
  0x50   : > { %s433_s18 = sshll.u32 %s1692_s30, 4  ;;  %s1693_s20 = smov [#allocation14]   ;;  %s434_s18 = int_to_ptr.vmem [resolvable:$true] %s433_s18 }
  0x51   : > { %s462_s11 = sshll.u32 %s1693_s20, 4  ;;  %s1537_s21 = scalar_lea.vmem %s434_s18, 16  ;;  %s463_s11 = int_to_ptr.vmem [resolvable:$true] %s462_s11 }
  0x52   : > { %p1538_p2 = scmp.ne.s32.totalorder %s434_s18, %s1537_s21  ;;  %s1544_s29 = scalar_lea.vmem %s434_s18, 32 }
  0x53   : > { %p1545_p8 = scmp.lt.s32.totalorder %s434_s18, %s434_s18  ;;  %p1546_p11 = scmp.lt.s32.totalorder %s1544_s29, %s1537_s21 }
  0x54   : > { %p1540_p4 = pnand %p1538_p2, %p1865_p13 }
  0x55   : > { %1326 = dma.hbm_to_vmem [thread:$0]  (!%p1857_p12), %s2177_s6, 512, %s403_s22, [#allocation7], %s1690_s24, %s1690_s24, %s1691_s28  }
  0x56   : > { %p1541_p7 = pneg %p1540_p4  ;;  %p1547_p0 = por %p1546_p11, %p1545_p8 }
  0x58   : > { %p1548_p9 = pnand %p1547_p0, %p1541_p7 }
  0x5a   : > { %1551 = shalt.err (!%p1548_p9)
}
  0x5b   : > { %1332 = dma.hbm_to_vmem [thread:$0]  (!%p1857_p12), %s2137_s10, 16, %s434_s18, [#allocation10]  }
  0x5c   : > { %s1563_s24 = scalar_lea.vmem %s463_s11, 1024  ;;  %p1571_p4 = scmp.lt.s32.totalorder %s463_s11, %s463_s11 }
  0x5d   : > { %p1564_p1 = scmp.ne.s32.totalorder %s463_s11, %s1563_s24  ;;  %p1572_p6 = scmp.lt.s32.totalorder %s1563_s24, %s1563_s24 }
  0x5f   : > { %p1566_p3 = pnand %p1564_p1, %p1865_p13  ;;  %p1573_p5 = por %p1572_p6, %p1571_p4 }
  0x61   : > { %p1567_p2 = pneg %p1566_p3 }
  0x63   : > { %p1574_p10 = pnand %p1573_p5, %p1567_p2 }
  0x65   : > { %1577 = shalt.err (!%p1574_p10)
}
  0x66   : > { %s1694_s21 = smov 64   ;;  %s1695_s28 = smov 4  }
  0x67   : > { %1338 = dma.hbm_to_vmem [thread:$0]  (!%p1857_p12), %s2141_s14, 1024, %s463_s11, [#allocation13], %s1694_s21, %s1694_s21, %s1695_s28  }
  0x68   : > { %p2178_p7 = scmp.ne.s32.totalorder %s2172_s27, 0 }
  0x69   : > { %p2179_p8 = scmp.eq.s32.totalorder (!%p2178_p7), %s1821_s2, 0 }
  0x6a   : > { %502 = sbr.rel (%p2178_p7) target bundleno = 497 (0x1f1), region = 72 }
  0x6f   : > { %1649 = dma.done.wait (%p2179_p8), [#allocation7], 512   ;;  %p2180_p13 = pmov %p2179_p8 }
  0x70   : > { %p2181_p5 = pmov %p2179_p8 }
  0x71   : > { %1651 = vsyncadd (%p2180_p13), [#allocation7], 4294966784 }
  0x72   : > { %1653 = dma.done.wait (%p2181_p5), [#allocation10], 32   ;;  %p2182_p6 = pmov %p2181_p5 }
  0x73   : > { %p2183_p10 = pmov %p2181_p5 }
  0x74   : > { %1655 = vsyncadd (%p2182_p6), [#allocation10], 4294967264 }
  0x75   : > { %1657 = dma.done.wait (%p2183_p10), [#allocation13], 1536   ;;  %p2184_p12 = pmov %p2181_p5 }
  0x76   : > { %p576_p11 = scmp.lt.s32.totalorder %s1821_s2, 1  ;;  %v1696_v0 = vmov 0   ;;  %v1697_v1 = vmov 0.0   ;;  %s2185_s5 = sld [smem:[#allocation30_spill]]  ;;  %v1406_v3 = vld [vmem:[%s2136_s9 + $0x38] sm:$0xff]   ;;  %v1407_v5 = vld [vmem:[%s2136_s9 + $0x30] sm:$0xff]   ;;  %v661_v31 = vlaneseq }
  0x77   : > { %1659 = vsyncadd (%p2184_p12), [#allocation13], 4294965760  ;;  %1404 = vset.pattern.permute.xlu0 %v1696_v0  ;;  %1259 = vmatprep.subr.bf16.mxu0 %v1697_v1  ;;  %s2186_s8 = sld [smem:[#allocation28_spill]]  ;;  %v1408_v6 = vld [vmem:[%s2136_s9 + $0x28] sm:$0xff]   ;;  %v1409_v7 = vld [vmem:[%s2136_s9 + $0x20] sm:$0xff]   ;;  %vm1698_vm0 = vmmov 0  }
  0x78   : > { %s577_s11 = scalar_select %p576_p11, %s1821_s2, 1  ;;  %1279 = vmatprep.subr.bf16.mxu1 %v1697_v1  ;;  %1405 = vset.pattern.permute.xlu1 %v1696_v0  ;;  %v1414_v8 = vld [vmem:[#allocation14 + $0x38] sm:$0xff]   ;;  %v1415_v10 = vld [vmem:[#allocation14 + $0x30] sm:$0xff]   ;;  %v1416_v11 = vld [vmem:[#allocation14 + $0x28] sm:$0xff]   ;;  %vm647_vm1 = vcmask 1040384   ;;  %vm649_vm2 = vcmask 1041408  }
  0x79   : > { %1260 = vmatpush3.bf16.msra.mxu0 %v1406_v3  ;;  %1280 = vmatpush3.bf16.msra.mxu1 %v1414_v8  ;;  %v1410_v9 = vld [vmem:[%s2136_s9 + $0x18] sm:$0xff]   ;;  %v1411_v12 = vld [vmem:[%s2136_s9 + $0x10] sm:$0xff]   ;;  %v1412_v13 = vld [vmem:[%s2136_s9 + $0x8] sm:$0xff]   ;;  %s2187_s4 = sld [smem:[#allocation29_spill]]  ;;  %s1964_s0 = sshll.u32 %s1821_s2, 3  ;;  %vm651_vm3 = vcmask 1042432  }
  0x7a   : > { %s1925_s27 = sshll.u32 %s577_s11, 3  ;;  %1261 = vmatprep.subr.bf16.mxu0 %v1697_v1  ;;  %1275 = vmatprep.mubr.msk.bf16.mxu0 %vm1698_vm0, %v1697_v1  ;;  %v1417_v14 = vld [vmem:[#allocation14 + $0x20] sm:$0xff]   ;;  %v1418_v15 = vld [vmem:[#allocation14 + $0x18] sm:$0xff]   ;;  %v1419_v17 = vld [vmem:[#allocation14 + $0x10] sm:$0xff]   ;;  %s2154_s23 = sadd.s32 2, %s1964_s0  ;;  %vm653_vm4 = vcmask 1043456  }
  0x7b   : > { %1281 = vmatprep.subr.bf16.mxu1 %v1697_v1  ;;  %1295 = vmatprep.mubr.msk.bf16.mxu1 %vm1698_vm0, %v1697_v1  ;;  %v1413_v16 = vld [vmem:[%s2136_s9] sm:$0xff]   ;;  %v1420_v18 = vld [vmem:[#allocation14 + $0x8] sm:$0xff]   ;;  %s2155_s20 = sadd.s32 3, %s1964_s0  ;;  %s603_s29 = sld [smem:[#allocation3 + %s2154_s23]]  ;;  %vm655_vm5 = vcmask 1044480   ;;  %v2007_v37 = vshrl.u32 %v661_v31, 7 }
  0x7c   : > { %s587_s18 = scalar_lea.vmem %s2185_s5, %s1925_s27  ;;  %v1421_v20 = vld [vmem:[#allocation14] sm:$0xff]   ;;  %s607_s24 = sld [smem:[#allocation3 + %s2155_s20]]  ;;  %v592_v40 = vld [vmem:[#allocation9] sm:$0x1]  ;;  %vm657_vm6 = vcmask 1045504   ;;  %vm659_vm7 = vcmask 1046528  }
  0x7d   : > { %s579_s22 = scalar_lea.vmem %s2186_s8, %s1925_s27  ;;  %v673_v2 = vld [vmem:[%s587_s18] sm:$0xff]  ;;  %1262 = vmatpush3.bf16.msra.mxu0 %v1407_v5  ;;  %1282 = vmatpush3.bf16.msra.mxu1 %v1415_v10  ;;  %s595_s8 = sld [smem:[#allocation3 + %s1964_s0]]  ;;  %v663_v44 = vsub.s32 0, %v2007_v37 }
  0x7e   : > { %676 = vperm.xlu0 %1404, %v673_v2   ;;  %v666_v4 = vld [vmem:[%s579_s22] sm:$0xff]  ;;  %1263 = vmatprep.subr.bf16.mxu0 %v1697_v1  ;;  %s610_s22 = sadd.s32 4, %s1964_s0  ;;  %s614_s21 = sadd.s32 5, %s1964_s0 }
  0x7f   : > { %1283 = vmatprep.subr.bf16.mxu1 %v1697_v1  ;;  %s583_s11 = scalar_lea.vmem %s2187_s4, %s1925_s27  ;;  %s2153_s27 = sadd.s32 1, %s1964_s0 }
  0x80   : > { %v862_v19 = vld [vmem:[%s583_s11] sm:$0xff]  ;;  %s599_s18 = sld [smem:[#allocation3 + %s2153_s27]]  ;;  %s2157_s1 = sadd.s32 6, %s1964_s0 }
  0x81   : > { %1264 = vmatpush3.bf16.msra.mxu0 %v1408_v6  ;;  %1284 = vmatpush3.bf16.msra.mxu1 %v1416_v11  ;;  %s611_s28 = sld [smem:[#allocation3 + %s610_s22]]  ;;  %s604_s4 = scalar_lea.vmem [#allocation6], %s603_s29 }
  0x82   : > { %669 = vperm.xlu0 %1404, %v666_v4   ;;  %1265 = vmatprep.subr.bf16.mxu0 %v1697_v1  ;;  %s615_s11 = sld [smem:[#allocation3 + %s614_s21]]  ;;  %v605_v22 = vld [vmem:[%s604_s4] sm:$0x1]  ;;  %s2156_s27 = sadd.s32 7, %s1964_s0 }
  0x83   : > { %1285 = vmatprep.subr.bf16.mxu1 %v1697_v1  ;;  %977 = vperm.xlu1 %1405, %v862_v19   ;;  %s596_s23 = scalar_lea.vmem [#allocation6], %s595_s8  ;;  %s619_s5 = sld [smem:[#allocation3 + %s2157_s1]]  ;;  %v630_v26 = vrot.slane %v605_v22, 6 }
  0x84   : > { %v597_v24 = vld [vmem:[%s596_s23] sm:$0x1]  ;;  %s1987_s20 = sld [smem:[#allocation5 + %s1821_s2]]  ;;  %s608_s6 = scalar_lea.vmem [#allocation6], %s607_s24 }
  0x85   : > { %1266 = vmatpush3.bf16.msra.mxu0 %v1409_v7  ;;  %1286 = vmatpush3.bf16.msra.mxu1 %v1417_v14  ;;  %v609_v25 = vld [vmem:[%s608_s6] sm:$0x1]  ;;  %s2188_s23 = sadd.s32 1, %s1964_s0  ;;  %s2189_s8 = sadd.s32 2, %s1964_s0 }
  0x86   : > { %1267 = vmatprep.subr.bf16.mxu0 %v1697_v1  ;;  %1287 = vmatprep.subr.bf16.mxu1 %v1697_v1  ;;  %s600_s30 = scalar_lea.vmem [#allocation6], %s599_s18  ;;  %s623_s18 = sld [smem:[#allocation3 + %s2156_s27]]  ;;  %v633_v29 = vrot.slane %v609_v25, 5 }
  0x87   : > { %v601_v21 = vld [vmem:[%s600_s30] sm:$0x1]  ;;  %s612_s4 = scalar_lea.vmem [#allocation6], %s611_s28  ;;  %s1995_s29 = sld [smem:[#allocation4 + %s2188_s23]] }
  0x88   : > { %v627_v23 = vrot.slane %v601_v21, 7  ;;  %v613_v28 = vld [vmem:[%s612_s4] sm:$0x1]  ;;  %s616_s6 = scalar_lea.vmem [#allocation6], %s615_s11  ;;  %s810_s24 = sld [smem:[#allocation4 + %s2189_s8]] }
  0x89   : > { %1268 = vmatpush3.bf16.msra.mxu0 %v1410_v9  ;;  %1288 = vmatpush3.bf16.msra.mxu1 %v1418_v15  ;;  %v617_v32 = vld [vmem:[%s616_s6] sm:$0x1]  ;;  %v636_v33 = vrot.slane %v613_v28, 4  ;;  %s2005_s27 = sld [smem:[#allocation4 + %s1964_s0]]  ;;  %s620_s1 = scalar_lea.vmem [#allocation6], %s619_s5 }
  0x8a   : > { %1269 = vmatprep.subr.bf16.mxu0 %v1697_v1  ;;  %1289 = vmatprep.subr.bf16.mxu1 %v1697_v1  ;;  %v648_v27 = vsel %vm647_vm1, %v597_v24, %v627_v23  ;;  %s590_s4 = scalar_lea.vmem %s2134_s7, %s1987_s20  ;;  %v621_v35 = vld [vmem:[%s620_s1] sm:$0x1]  ;;  %v639_v36 = vrot.slane %v617_v32, 3  ;;  %s2190_s11 = sadd.s32 3, %s1964_s0  ;;  %v1217_v28 = vld [vmem:[#allocation11] ss:$0 sm:$0xff] }
  0x8b   : > { %v650_v30 = vsel %vm649_vm2, %v648_v27, %v630_v26  ;;  %s813_s23 = sld [smem:[#allocation4 + %s2190_s11]]  ;;  %v591_v39 = vld [vmem:[%s590_s4] sm:$0x1]  ;;  %v642_v42 = vrot.slane %v621_v35, 2  ;;  %s2191_s28 = sadd.s32 6, %s1964_s0 }
  0x8c   : > { %v652_v34 = vsel %vm651_vm3, %v650_v30, %v633_v29  ;;  %s624_s6 = scalar_lea.vmem [#allocation6], %s623_s18  ;;  %s816_s5 = sld [smem:[#allocation4 + %s610_s22]]  ;;  %v593_v45 = vadd.f32 %v592_v40, %v591_v39 }
  0x8d   : > { %1270 = vmatpush3.bf16.msra.mxu0 %v1411_v12  ;;  %1290 = vmatpush3.bf16.msra.mxu1 %v1419_v17  ;;  %v654_v38 = vsel %vm653_vm4, %v652_v34, %v636_v33  ;;  %v625_v41 = vld [vmem:[%s624_s6] sm:$0x1]  ;;  %s808_s1 = scalar_lea.vmem [#allocation12], %s1995_s29  ;;  %s819_s18 = sld [smem:[#allocation4 + %s614_s21]] }
  0x8e   : > { %1271 = vmatprep.subr.bf16.mxu0 %v1697_v1  ;;  %1291 = vmatprep.subr.bf16.mxu1 %v1697_v1  ;;  %v656_v43 = vsel %vm655_vm5, %v654_v38, %v639_v36  ;;  %v645_v46 = vrot.slane %v625_v41, 1  ;;  %v809_v47 = vld [vmem:[%s808_s1] sm:$0x1]  ;;  %v664_v49 = vrot.slane %v593_v45, %v663_v44  ;;  %s811_s8 = scalar_lea.vmem [#allocation12], %s810_s24  ;;  %s822_s22 = sld [smem:[#allocation4 + %s2191_s28]] }
  0x8f   : > { %v658_v48 = vsel %vm657_vm6, %v656_v43, %v642_v42  ;;  %v812_v50 = vld [vmem:[%s811_s8] sm:$0x1]  ;;  %v829_v51 = vrot.slane %v809_v47, 7  ;;  %s805_s30 = scalar_lea.vmem [#allocation12], %s2005_s27  ;;  %s2192_s29 = sadd.s32 7, %s1964_s0 }
  0x90   : > { %v660_v52 = vsel %vm659_vm7, %v658_v48, %v645_v46  ;;  %v806_v53 = vld [vmem:[%s805_s30] sm:$0x1]  ;;  %v832_v55 = vrot.slane %v812_v50, 6  ;;  %s825_s11 = sld [smem:[#allocation4 + %s2192_s29]]  ;;  %s1237_s28 = sshll.u32 %s1821_s2, 7 }
  0x91   : > { %1272 = vmatpush3.bf16.msra.mxu0 %v1412_v13  ;;  %1292 = vmatpush3.bf16.msra.mxu1 %v1420_v18  ;;  %s814_s4 = scalar_lea.vmem [#allocation12], %s813_s23  ;;  %v665_v56 = vadd.f32 %v664_v49, %v660_v52  ;;  %v849_v57 = vsel %vm647_vm1, %v806_v53, %v829_v51  ;;  %s799_s23 = scalar_lea.vmem %s2139_s12, %s1987_s20 }
  0x92   : > { %1273 = vmatprep.subr.bf16.mxu0 %v1697_v1  ;;  %1293 = vmatprep.subr.bf16.mxu1 %v1697_v1  ;;  %v815_v54 = vld [vmem:[%s814_s4] sm:$0x1]  ;;  %s817_s21 = scalar_lea.vmem [#allocation12], %s816_s5  ;;  %v850_v61 = vsel %vm649_vm2, %v849_v57, %v832_v55  ;;  %s2041_s20 = sand.u32 1, %s1674_s19  }
  0x93   : > { %v818_v58 = vld [vmem:[%s817_s21] sm:$0x1]  ;;  %v835_v59 = vrot.slane %v815_v54, 5  ;;  %s820_s27 = scalar_lea.vmem [#allocation12], %s819_s18  ;;  %s2193_s18 = sld [smem:[#allocation34_spill]] }
  0x94   : > { %v821_v63 = vld [vmem:[%s820_s27] sm:$0x1]  ;;  %v838_v0 = vrot.slane %v818_v58, 4  ;;  %s823_s6 = scalar_lea.vmem [#allocation12], %s822_s22  ;;  %s1211_s30 = sshll.u32 %s2041_s20, 3 }
  0x95   : > { %1274 = vmatpush3.bf16.msra.mxu0 %v1413_v16  ;;  %1294 = vmatpush3.bf16.msra.mxu1 %v1421_v20  ;;  %v851_v2 = vsel %vm651_vm3, %v850_v61, %v835_v59  ;;  %v824_v6 = vld [vmem:[%s823_s6] sm:$0x1]  ;;  %v841_v7 = vrot.slane %v821_v63, 3  ;;  %s568_s22 = scalar_lea.vmem [#allocation15], %s1211_s30  ;;  %s2052_s21 = scalar_lea.hbm %s2143_s16, %s1237_s28 }
  0x96   : > { %v852_v8 = vsel %vm653_vm4, %v851_v2, %v838_v0  ;;  %v800_v12 = vld [vmem:[%s799_s23] sm:$0x1]  ;;  %s826_s8 = scalar_lea.vmem [#allocation12], %s825_s11  ;;  %v844_v14 = vrot.slane %v824_v6, 2  ;;  %s1001_s4 = sshll.u32 %s568_s22, 4  ;;  %s2054_s4 = int_to_ptr.vmem [resolvable:$true] %s1001_s4 }
  0x97   : > { %v827_v13 = vld [vmem:[%s826_s8] sm:$0x1]  ;;  %v853_v16 = vsel %vm655_vm5, %v852_v8, %v841_v7  ;;  %s983_s27 = scalar_lea.sflag [#allocation8], %s2041_s20  ;;  %s1578_s0 = scalar_lea.vmem %s2054_s4, 128 }
  0x98   : > { %v847_v19 = vrot.slane %v827_v13, 1  ;;  %v854_v20 = vsel %vm657_vm6, %v853_v16, %v844_v14  ;;  %p1579_p0 = scmp.ne.s32.totalorder %s2054_s4, %s1578_s0  ;;  %p2194_p9 = scmp.ne.s32.totalorder %s2170_s25, 0 }
  0x99   : > { %v801_v11 = vld [vmem:[%s2193_s18] sm:$0x1]  ;;  %s1699_s24 = smov [#allocation15]  }
  0x9a   : > { %v802_v18 = vadd.f32 %v801_v11, %v800_v12  ;;  %v855_v23 = vsel %vm659_vm7, %v854_v20, %v847_v19  ;;  %p1580_p1 = pnand %p1579_p0, %p2194_p9  ;;  %s1582_s23 = sshll.u32 %s1699_s24, 4  ;;  %s1583_s23 = int_to_ptr.vmem [resolvable:$false] %s1582_s23 }
  0x9b   : > { %s1584_s6 = scalar_lea.vmem %s1583_s23, 256  ;;  %p1585_p2 = scmp.lt.s32.totalorder %s2054_s4, %s1583_s23 }
  0x9c   : > { %p1581_p3 = pneg %p1580_p1  ;;  %p1586_p4 = scmp.lt.s32.totalorder %s1584_s6, %s1578_s0 }
  0x9e   : > { %p1587_p7 = por %p1586_p4, %p1585_p2 }
  0xa0   : > { %p1588_p8 = pnand %p1587_p7, %p1581_p3 }
  0xf9   : > { %v677_v60 = vpop.permute.xlu0 %676 }
  0xfa   : > { %v679_v62 = vmul.f32 %v677_v60, %v665_v56 }
  0xfc   : > { %v680_v1 = vrot.slane %v679_v62, 4 }
  0xfd   : > { %v670_v3 = vpop.permute.xlu0 %669 }
  0xfe   : > { %v681_v4 = vadd.f32 %v680_v1, %v679_v62  ;;  %v672_v5 = vmul.f32 %v670_v3, %v665_v56 }
 0x100   : > { %v682_v9 = vrot.slane %v681_v4, 2  ;;  %v686_v10 = vpack.c.bf16 %v672_v5, %v672_v5 }
 0x102   : > { %v683_v15 = vadd.f32 %v682_v9, %v681_v4  ;;  %1276 = vmatmul.mubr.bf16.vlgmr.msra.gmra.mxu0 %v686_v10 }
 0x104   : > { %v684_v17 = vrot.slane %v683_v15, 1 }
 0x106   : > { %v685_v21 = vadd.f32 %v684_v17, %v683_v15 }
 0x108   : > { %v803_v22 = vadd.f32 %v802_v18, %v685_v21 }
 0x10a   : > { %v859_v24 = vrot.slane %v803_v22, %v663_v44 }
 0x10c   : > { %v860_v25 = vadd.f32 %v859_v24, %v855_v23 }
 0x10e   : > { %1422 = vtanh.f32 %v860_v25 }
 0x11b   : > { %v1423_v26 = vpop.eup %1422 }
 0x11c   : > { %v863_v27 = vpack.c.bf16 %v1423_v26, %v1423_v26 }
 0x11e   : > { %1296 = vmatmul.mubr.bf16.vlgmr.msra.gmra.mxu1 %v863_v27 }
 0x1c2   : > { %v792_v29 = vpop.f32.mrf.mxu0 }
 0x1c3   : > { %v793_v30 = vadd.f32 %v1217_v28, %v792_v29 }
 0x1c4   : > { %v1277_v31 = vpop.f32.mrf.mxu0 }
 0x1c5   : > { %798 = vst [vmem:[%s568_s22] sm:$0xff] %v793_v30 }
 0x1c6   : > { %v795_v32 = vpop.f32.mrf.mxu0 }
 0x1c7   : > { %1591 = shalt.err (!%p1588_p8)
}
 0x1c8   : > { %s1592_s5 = scalar_lea.hbm %s2052_s21, 128  ;;  %s1596_s8 = scalar_lea.hbm %s2143_s16, 256 }
 0x1c9   : > { %p1593_p13 = scmp.ne.s32.totalorder %s2052_s21, %s1592_s5  ;;  %p1597_p10 = scmp.lt.s32.totalorder %s2052_s21, %s2143_s16 }
 0x1ca   : > { %p1598_p12 = scmp.lt.s32.totalorder %s1596_s8, %s1592_s5 }
 0x1cb   : > { %p1594_p5 = pnand %p1593_p13, %p2194_p9 }
 0x1cc   : > { %p1599_p11 = por %p1598_p12, %p1597_p10 }
 0x1cd   : > { %p1595_p6 = pneg %p1594_p5 }
 0x1cf   : > { %p1600_p0 = pnand %p1599_p11, %p1595_p6 }
 0x1d1   : > { %1603 = shalt.err (!%p1600_p0)
}
 0x1d2   : > { %1319 = dma.vmem_to_hbm [thread:$0]  (%p2194_p9), %s2054_s4, 128, %s2052_s21, %s983_s27   ;;  %v1278_v33 = vpop.f32.mrf.mxu0  ;;  %v1226_v34 = vld [vmem:[%s2142_s15] ss:$0 sm:$0xff]  ;;  %v978_v36 = vpop.permute.xlu1 %977 }
 0x1d3   : > { %s575_s24 = scalar_lea.vmem [#allocation16], %s1211_s30  ;;  %s2087_s1 = scalar_lea.hbm %s2144_s17, %s1237_s28 }
 0x1d4   : > { %s1014_s23 = sshll.u32 %s575_s24, 4  ;;  %s988_s4 = scalar_lea.sflag [#allocation17], %s2041_s20  ;;  %s2089_s23 = int_to_ptr.vmem [resolvable:$true] %s1014_s23 }
 0x1d5   : > { %s1604_s30 = scalar_lea.vmem %s2089_s23, 128  ;;  %s1700_s2 = smov [#allocation16]  }
 0x1d6   : > { %p1605_p1 = scmp.ne.s32.totalorder %s2089_s23, %s1604_s30  ;;  %s1608_s21 = sshll.u32 %s1700_s2, 4  ;;  %s1609_s21 = int_to_ptr.vmem [resolvable:$false] %s1608_s21 }
 0x1d7   : > { %s1610_s27 = scalar_lea.vmem %s1609_s21, 256  ;;  %p1611_p4 = scmp.lt.s32.totalorder %s2089_s23, %s1609_s21 }
 0x1d8   : > { %p1606_p3 = pnand %p1605_p1, %p2194_p9  ;;  %p1612_p7 = scmp.lt.s32.totalorder %s1610_s27, %s1604_s30 }
 0x1da   : > { %p1607_p2 = pneg %p1606_p3  ;;  %p1613_p8 = por %p1612_p7, %p1611_p4 }
 0x1dc   : > { %p1614_p13 = pnand %p1613_p8, %p1607_p2 }
 0x1de   : > { %v969_v35 = vpop.f32.mrf.mxu1 }
 0x1df   : > { %v970_v37 = vadd.f32 %v1226_v34, %v969_v35 }
 0x1e0   : > { %v1297_v38 = vpop.f32.mrf.mxu1 }
 0x1e1   : > { %v980_v39 = vmul.f32 %v978_v36, %v970_v37 }
 0x1e2   : > { %v972_v40 = vpop.f32.mrf.mxu1 }
 0x1e3   : > { %981 = vst [vmem:[%s575_s24] sm:$0xff] %v980_v39 }
 0x1e4   : > { %v1298_v41 = vpop.f32.mrf.mxu1 }
 0x1e5   : > { %1617 = shalt.err (!%p1614_p13)
}
 0x1e6   : > { %s1618_s28 = scalar_lea.hbm %s2087_s1, 128  ;;  %s1622_s8 = scalar_lea.hbm %s2144_s17, 256 }
 0x1e7   : > { %p1619_p5 = scmp.ne.s32.totalorder %s2087_s1, %s1618_s28  ;;  %p1623_p12 = scmp.lt.s32.totalorder %s2087_s1, %s2144_s17 }
 0x1e8   : > { %p1624_p11 = scmp.lt.s32.totalorder %s1622_s8, %s1618_s28 }
 0x1e9   : > { %p1620_p6 = pnand %p1619_p5, %p2194_p9 }
 0x1ea   : > { %p1625_p0 = por %p1624_p11, %p1623_p12 }
 0x1eb   : > { %p1621_p10 = pneg %p1620_p6 }
 0x1ed   : > { %p1626_p1 = pnand %p1625_p0, %p1621_p10 }
 0x1ef   : > { %1629 = shalt.err (!%p1626_p1)
}
 0x1f0   : > { %1320 = dma.vmem_to_hbm [thread:$0]  (%p2194_p9), %s2089_s23, 128, %s2087_s1, %s988_s4  }
 0x1f1 PF: > { %p1356_p3 = scmp.ge.s32.totalorder %s1682_s3, 2  ;;  %s1026_s11 = sand.u32 1, %s1670_s13  }
 0x1f2   : > { %p2195_p2 = scmp.ne.s32.totalorder %s2171_s26, 0  ;;  %s1027_s0 = scalar_lea.sflag [#allocation8], %s1026_s11 }
 0x1f4   : > { %p1340_p4 = pnand %p1356_p3, %p2195_p2 }
 0x1f6   : > { %p1341_p7 = pneg %p1340_p4 }
 0x1f8   : > { %1661 = dma.done.wait (%p1341_p7), %s1027_s0, 128  }
 0x1f9   : > { %1663 = vsyncadd (%p1341_p7), %s1027_s0, 4294967168  ;;  %s1036_s24 = scalar_lea.sflag [#allocation17], %s1026_s11 }
 0x1fa   : > { %1665 = dma.done.wait (%p1341_p7), %s1036_s24, 128  }
 0x1fb   : > { %1667 = vsyncadd (%p1341_p7), %s1036_s24, 4294967168  ;;  %s2196_s3 = sld [smem:[#allocation25_spill]]  ;;  %s2199_s13 = smov %s1674_s19 }
 0x1fc   : > { %s2197_s25 = sld [smem:[#allocation24_spill]] }
 0x1fd   : > { %s2198_s1 = sld [smem:[#allocation26_spill]] }
 0x201   : > { %p42_p9 = scmp.ge.s32.totalorder %s2196_s3, 4  }
 0x202   : > { %s2200_s19 = smov %s2197_s25 }
 0x203   :  { %44 = sbr.rel (!%p42_p9) target bundleno = 29 (0x1d), region = 169 }
 0x208   :  { %1041 = vsyncpa [#allocation7], 1 }
 0x209   :  { %1043 = vsyncpa [#allocation7 + $0x1], 1 }
 0x20a   :  { %1044 = vsyncpa [#allocation10], 1 }
 0x20b   :  { %1045 = vsyncpa [#allocation13], 1 }
 0x20c   :  { %1046 = vsyncpa [#allocation8], 1 }
 0x20d   :  { %1048 = vsyncpa [#allocation8 + $0x1], 1 }
 0x20e   :  { %1049 = vsyncpa [#allocation17], 1 }
 0x20f   :  { %1051 = vsyncpa [#allocation17 + $0x1], 1 }

</bundles_post_ra>
